<compile_context>
chip_gen: v7x
topology: tpu7x:2x2x1
jax: 0.10.0
libtpu: 0.0.40
codegen_flags: <defaults>
</compile_context>

<pallas_src>
import functools

import jax
import jax.numpy as jnp
from jax.experimental import pallas as pl
from jax.experimental.pallas import tpu as pltpu


def _round_up(x, m):
    return (x + m - 1) // m * m


# ----------------------------------------------------------------------------
# Kernel
# ----------------------------------------------------------------------------
def _vae_kernel(x_ref, eps_ref,
                w_enc_ref, b_enc_ref,
                w_head_ref, b_head_ref,
                w_dec1_ref, b_dec1_ref,
                w_dec2_ref, b_dec2_ref,
                out_ref, zmv_ref, *, zp):
    x = x_ref[...]                                  # (TM, Dp) f32 row tile
    eps = eps_ref[...]                              # (TM, Zp) f32 row tile

    # ---- encoder trunk: (TM, Dp) @ (Dp, Hp), bf16 operands, f32 accumulate --
    h = jnp.dot(x.astype(jnp.bfloat16), w_enc_ref[...],
                preferred_element_type=jnp.float32)
    h = jnp.maximum(h + b_enc_ref[...], 0.0)        # ReLU in f32, (TM, Hp)

    # ---- fused mean || log_var head: one (TM, Hp) @ (Hp, 2*Zp) matmul -------
    head = jnp.dot(h.astype(jnp.bfloat16), w_head_ref[...],
                   preferred_element_type=jnp.float32) + b_head_ref[...]
    mean = head[:, :zp]                             # (TM, Zp)
    log_var = head[:, zp:]                          # (TM, Zp)

    # ---- reparameterization (f32; exp lands on the EUP slot) ----------------
    latent = mean + jnp.exp(0.5 * log_var) * eps    # (TM, Zp)

    # ---- decoder -------------------------------------------------------------
    h2 = jnp.dot(latent.astype(jnp.bfloat16), w_dec1_ref[...],
                 preferred_element_type=jnp.float32)
    h2 = jnp.maximum(h2 + b_dec1_ref[...], 0.0)     # (TM, Hp)
    logits = jnp.dot(h2.astype(jnp.bfloat16), w_dec2_ref[...],
                     preferred_element_type=jnp.float32) + b_dec2_ref[...]

    out_ref[...] = jax.nn.sigmoid(logits)           # (TM, Dp) f32

    # lane-dense packed small outputs: [latent | mean | log_var], 128-aligned
    zmv_ref[:, :zp] = latent
    zmv_ref[:, zp:2 * zp] = mean
    zmv_ref[:, 2 * zp:] = log_var


# ----------------------------------------------------------------------------
# Parameter packing: pad to 128-lane multiples, fuse mu||log_var, cast bf16
# ----------------------------------------------------------------------------
def pack_params(params, *, lane=128):
    w_enc, w_mu, w_lv = params["w_enc"], params["w_mu"], params["w_lv"]
    w_dec1, w_dec2 = params["w_dec1"], params["w_dec2"]
    D, H = w_enc.shape
    Z = w_mu.shape[1]
    Dp, Hp, Zp = _round_up(D, lane), _round_up(H, lane), _round_up(Z, lane)

    def pad_w(w, r, c):
        return jnp.pad(w.astype(jnp.float32),
                       ((0, r - w.shape[0]), (0, c - w.shape[1])))

    def pad_b(b, c):
        b = jnp.asarray(b, jnp.float32).reshape(1, -1)
        return jnp.pad(b, ((0, 0), (0, c - b.shape[1])))

    w_head = jnp.concatenate([pad_w(w_mu, Hp, Zp), pad_w(w_lv, Hp, Zp)], axis=1)
    b_head = jnp.concatenate([pad_b(params["b_mu"], Zp),
                              pad_b(params["b_lv"], Zp)], axis=1)

    return dict(
        D=D, Z=Z, Dp=Dp, Hp=Hp, Zp=Zp,
        w_enc=pad_w(w_enc, Dp, Hp).astype(jnp.bfloat16),
        b_enc=pad_b(params["b_enc"], Hp),
        w_head=w_head.astype(jnp.bfloat16),
        b_head=b_head,
        w_dec1=pad_w(w_dec1, Zp, Hp).astype(jnp.bfloat16),
        b_dec1=pad_b(params["b_dec1"], Hp),
        w_dec2=pad_w(w_dec2, Hp, Dp).astype(jnp.bfloat16),
        b_dec2=pad_b(params["b_dec2"], Dp),
    )


# ----------------------------------------------------------------------------
# Wrapper
# ----------------------------------------------------------------------------
def vae_forward(x_nchw, eps, packed, *, tm=None):
    """Full VAE forward in one Pallas kernel.

    Returns (out_nchw, latent, mean, log_var) — same tuple as the PyTorch VAE.
    """
    B, C, Hs, Ws = x_nchw.shape
    D = C * Hs * Ws
    assert D == packed["D"]
    Z, Dp, Hp, Zp = packed["Z"], packed["Dp"], packed["Hp"], packed["Zp"]

    # Batch tile: multiple of 8 sublanes; 128 rows once the batch is large.
    if tm is None:
        tm = min(128, _round_up(B, 8))
    Bp = _round_up(B, tm)

    x_flat = x_nchw.reshape(B, D).astype(jnp.float32)
    x_pad = jnp.zeros((Bp, Dp), jnp.float32).at[:B, :D].set(x_flat)
    eps_pad = jnp.zeros((Bp, Zp), jnp.float32).at[:B, :Z].set(
        eps.astype(jnp.float32))

    def row_spec(n):            # row-tiled operands/outputs
        return pl.BlockSpec((tm, n), lambda i: (i, 0))

    def pinned(a):              # weights stay VMEM-resident across grid steps
        return pl.BlockSpec(a.shape, lambda i: (0, 0))

    kernel = functools.partial(_vae_kernel, zp=Zp)

    out_pad, zmv = pl.pallas_call(
        kernel,
        grid=(Bp // tm,),
        out_shape=(jax.ShapeDtypeStruct((Bp, Dp), jnp.float32),
                   jax.ShapeDtypeStruct((Bp, 3 * Zp), jnp.float32)),
        in_specs=[row_spec(Dp), row_spec(Zp),
                  pinned(packed["w_enc"]), pinned(packed["b_enc"]),
                  pinned(packed["w_head"]), pinned(packed["b_head"]),
                  pinned(packed["w_dec1"]), pinned(packed["b_dec1"]),
                  pinned(packed["w_dec2"]), pinned(packed["b_dec2"])],
        out_specs=(row_spec(Dp), row_spec(3 * Zp)),
        compiler_params=pltpu.CompilerParams(
            dimension_semantics=("parallel",),
            vmem_limit_bytes=32 * 1024 * 1024),
    )(x_pad, eps_pad,
      packed["w_enc"], packed["b_enc"],
      packed["w_head"], packed["b_head"],
      packed["w_dec1"], packed["b_dec1"],
      packed["w_dec2"], packed["b_dec2"])

    out = out_pad[:B, :D].reshape(B, C, Hs, Ws)
    latent = zmv[:B, :Z]
    mean = zmv[:B, Zp:Zp + Z]
    log_var = zmv[:B, 2 * Zp:2 * Zp + Z]
    return out, latent, mean, log_var


# ----------------------------------------------------------------------------
# Init + references
# ----------------------------------------------------------------------------
def init_params(key, D, H, Z):
    ks = jax.random.split(key, 5)

    def lin(k, fan_in, fan_out):
        w = jax.random.normal(k, (fan_in, fan_out), jnp.float32) / jnp.sqrt(fan_in)
        b = jnp.zeros((fan_out,), jnp.float32)
        return w, b

    w_enc, b_enc = lin(ks[0], D, H)
    w_mu, b_mu = lin(ks[1], H, Z)
    w_lv, b_lv = lin(ks[2], H, Z)
    w_dec1, b_dec1 = lin(ks[3], Z, H)
    w_dec2, b_dec2 = lin(ks[4], H, D)
    return dict(w_enc=w_enc, b_enc=b_enc, w_mu=w_mu, b_mu=b_mu,
                w_lv=w_lv, b_lv=b_lv, w_dec1=w_dec1, b_dec1=b_dec1,
                w_dec2=w_dec2, b_dec2=b_dec2)


def vae_forward_ref_f32(x_nchw, eps, params):
    """Pure-f32 reference (PyTorch-module semantics)."""
    B = x_nchw.shape[0]
    x = x_nchw.reshape(B, -1).astype(jnp.float32)
    h = jnp.maximum(x @ params["w_enc"] + params["b_enc"], 0.0)
    mean = h @ params["w_mu"] + params["b_mu"]
    log_var = h @ params["w_lv"] + params["b_lv"]
    latent = mean + jnp.exp(0.5 * log_var) * eps
    h2 = jnp.maximum(latent @ params["w_dec1"] + params["b_dec1"], 0.0)
    out = jax.nn.sigmoid(h2 @ params["w_dec2"] + params["b_dec2"])
    return out.reshape(x_nchw.shape), latent, mean, log_var


def vae_forward_ref_bf16(x_nchw, eps, packed):
    """Mirrors the kernel's bf16-operand / f32-accumulate math (tight check)."""
    B, C, Hs, Ws = x_nchw.shape
    D, Z, Dp, Zp = packed["D"], packed["Z"], packed["Dp"], packed["Zp"]
    x = x_nchw.reshape(B, -1).astype(jnp.float32)
    xp = jnp.pad(x, ((0, 0), (0, Dp - D)))
    epsp = jnp.pad(eps.astype(jnp.float32), ((0, 0), (0, Zp - Z)))

    def mm(a, w):
        return jnp.dot(a.astype(jnp.bfloat16), w,
                       preferred_element_type=jnp.float32)

    h = jnp.maximum(mm(xp, packed["w_enc"]) + packed["b_enc"], 0.0)
    head = mm(h, packed["w_head"]) + packed["b_head"]
    mean, log_var = head[:, :Zp], head[:, Zp:]
    latent = mean + jnp.exp(0.5 * log_var) * epsp
    h2 = jnp.maximum(mm(latent, packed["w_dec1"]) + packed["b_dec1"], 0.0)
    out = jax.nn.sigmoid(mm(h2, packed["w_dec2"]) + packed["b_dec2"])
    return (out[:, :D].reshape(B, C, Hs, Ws),
            latent[:, :Z], mean[:, :Z], log_var[:, :Z])


# ----------------------------------------------------------------------------
if __name__ == "__main__":
    B, C, Himg, Wimg = 2, 4, 16, 16
    D = C * Himg * Wimg          # 1024
    HID = 32                     # encoder/decoder hidden width
    Z = 8                        # latent dim

    key = jax.random.PRNGKey(0)
    k_x, k_eps, k_p = jax.random.split(key, 3)

    x = jax.random.normal(k_x, (B, C, Himg, Wimg), jnp.float32)
    eps = jax.random.normal(k_eps, (B, Z), jnp.float32)   # deterministic noise
    params = init_params(k_p, D, HID, Z)
    packed = pack_params(params)

    out, latent, mean, log_var = jax.block_until_ready(
        vae_forward(x, eps, packed))

    assert out.shape == (B, C, Himg, Wimg)
    assert latent.shape == (B, Z) and mean.shape == (B, Z) and log_var.shape == (B, Z)

    # Tight check vs. a reference using identical bf16-operand math.
    refs_bf16 = vae_forward_ref_bf16(x, eps, packed)
    for a, b in zip((out, latent, mean, log_var), refs_bf16):
        assert jnp.allclose(a, b, atol=5e-3, rtol=5e-3), "mismatch vs bf16 ref"

    # Loose sanity check vs. the pure-f32 module semantics (bf16 operands).
    refs_f32 = vae_forward_ref_f32(x, eps, params)
    for a, b in zip((out, latent, mean, log_var), refs_f32):
        assert jnp.allclose(a, b, atol=1e-1, rtol=1e-1), "mismatch vs f32 ref"

    print("KERNEL_OK")
</pallas_src>

<mosaic_0001>
module attributes {stable_mosaic.version = 11 : i64} {
  func.func @_vae_kernel(%arg0: i32, %arg1: memref<8x1024xf32, #tpu.memory_space<vmem>>, %arg2: memref<8x128xf32, #tpu.memory_space<vmem>>, %arg3: memref<1024x128xbf16, #tpu.memory_space<vmem>>, %arg4: memref<1x128xf32, #tpu.memory_space<vmem>>, %arg5: memref<128x256xbf16, #tpu.memory_space<vmem>>, %arg6: memref<1x256xf32, #tpu.memory_space<vmem>>, %arg7: memref<128x128xbf16, #tpu.memory_space<vmem>>, %arg8: memref<1x128xf32, #tpu.memory_space<vmem>>, %arg9: memref<128x1024xbf16, #tpu.memory_space<vmem>>, %arg10: memref<1x1024xf32, #tpu.memory_space<vmem>>, %arg11: memref<8x1024xf32, #tpu.memory_space<vmem>>, %arg12: memref<8x384xf32, #tpu.memory_space<vmem>>) attributes {dimension_semantics = [#tpu.dimension_semantics<parallel>], iteration_bounds = array<i64: 1>, scalar_prefetch = 0 : i64, scratch_operands = 0 : i64, tpu.core_type = #tpu.core_type<tc>, window_params = [{transform_indices = @transform_0, window_bounds = array<i64: 8, 1024>}, {transform_indices = @transform_1, window_bounds = array<i64: 8, 128>}, {pipeline_mode = #tpu.pipeline_mode<synchronous>, transform_indices = @transform_2, window_bounds = array<i64: 1024, 128>}, {pipeline_mode = #tpu.pipeline_mode<synchronous>, transform_indices = @transform_3, window_bounds = array<i64: 1, 128>}, {pipeline_mode = #tpu.pipeline_mode<synchronous>, transform_indices = @transform_4, window_bounds = array<i64: 128, 256>}, {pipeline_mode = #tpu.pipeline_mode<synchronous>, transform_indices = @transform_5, window_bounds = array<i64: 1, 256>}, {pipeline_mode = #tpu.pipeline_mode<synchronous>, transform_indices = @transform_6, window_bounds = array<i64: 128, 128>}, {pipeline_mode = #tpu.pipeline_mode<synchronous>, transform_indices = @transform_7, window_bounds = array<i64: 1, 128>}, {pipeline_mode = #tpu.pipeline_mode<synchronous>, transform_indices = @transform_8, window_bounds = array<i64: 128, 1024>}, {pipeline_mode = #tpu.pipeline_mode<synchronous>, transform_indices = @transform_9, window_bounds = array<i64: 1, 1024>}, {transform_indices = @transform_10, window_bounds = array<i64: 8, 1024>}, {transform_indices = @transform_11, window_bounds = array<i64: 8, 384>}]} {
    %c0 = arith.constant 0 : index
    %c0_0 = arith.constant 0 : index
    %0 = vector.load %arg1[%c0, %c0_0] : memref<8x1024xf32, #tpu.memory_space<vmem>>, vector<8x1024xf32>
    %c0_1 = arith.constant 0 : index
    %c0_2 = arith.constant 0 : index
    %1 = vector.load %arg2[%c0_1, %c0_2] : memref<8x128xf32, #tpu.memory_space<vmem>>, vector<8x128xf32>
    %2 = arith.truncf %0 : vector<8x1024xf32> to vector<8x1024xbf16>
    %c0_3 = arith.constant 0 : index
    %c0_4 = arith.constant 0 : index
    %3 = vector.load %arg3[%c0_3, %c0_4] : memref<1024x128xbf16, #tpu.memory_space<vmem>>, vector<1024x128xbf16>
    %cst = arith.constant dense<0.000000e+00> : vector<8x128xf32>
    %4 = tpu.matmul %2, %3, %cst {dimension_numbers = #tpu.dot_dimension_numbers<[1], [0], [0], [1], [0, 0, 1, 1], [], []>} : vector<8x1024xbf16>, vector<1024x128xbf16>, vector<8x128xf32> -> vector<8x128xf32>
    %c0_5 = arith.constant 0 : index
    %c0_6 = arith.constant 0 : index
    %5 = vector.load %arg4[%c0_5, %c0_6] : memref<1x128xf32, #tpu.memory_space<vmem>>, vector<1x128xf32>
    %6 = vector.broadcast %5 : vector<1x128xf32> to vector<8x128xf32>
    %7 = arith.addf %4, %6 : vector<8x128xf32>
    %cst_7 = arith.constant 0.000000e+00 : f32
    %8 = vector.broadcast %cst_7 : f32 to vector<8x128xf32>
    %9 = arith.maximumf %7, %8 : vector<8x128xf32>
    %10 = arith.truncf %9 : vector<8x128xf32> to vector<8x128xbf16>
    %c0_8 = arith.constant 0 : index
    %c0_9 = arith.constant 0 : index
    %11 = vector.load %arg5[%c0_8, %c0_9] : memref<128x256xbf16, #tpu.memory_space<vmem>>, vector<128x256xbf16>
    %cst_10 = arith.constant dense<0.000000e+00> : vector<8x256xf32>
    %12 = tpu.matmul %10, %11, %cst_10 {dimension_numbers = #tpu.dot_dimension_numbers<[1], [0], [0], [1], [0, 0, 1, 1], [], []>} : vector<8x128xbf16>, vector<128x256xbf16>, vector<8x256xf32> -> vector<8x256xf32>
    %c0_11 = arith.constant 0 : index
    %c0_12 = arith.constant 0 : index
    %13 = vector.load %arg6[%c0_11, %c0_12] : memref<1x256xf32, #tpu.memory_space<vmem>>, vector<1x256xf32>
    %14 = vector.broadcast %13 : vector<1x256xf32> to vector<8x256xf32>
    %15 = arith.addf %12, %14 : vector<8x256xf32>
    %16 = vector.extract_strided_slice %15 {offsets = [0, 0], sizes = [8, 128], strides = [1, 1]} : vector<8x256xf32> to vector<8x128xf32>
    %17 = vector.extract_strided_slice %15 {offsets = [0, 128], sizes = [8, 128], strides = [1, 1]} : vector<8x256xf32> to vector<8x128xf32>
    %cst_13 = arith.constant 5.000000e-01 : f32
    %18 = vector.broadcast %cst_13 : f32 to vector<8x128xf32>
    %19 = arith.mulf %18, %17 : vector<8x128xf32>
    %20 = math.exp %19 : vector<8x128xf32>
    %21 = arith.mulf %20, %1 : vector<8x128xf32>
    %22 = arith.addf %16, %21 : vector<8x128xf32>
    %23 = arith.truncf %22 : vector<8x128xf32> to vector<8x128xbf16>
    %c0_14 = arith.constant 0 : index
    %c0_15 = arith.constant 0 : index
    %24 = vector.load %arg7[%c0_14, %c0_15] : memref<128x128xbf16, #tpu.memory_space<vmem>>, vector<128x128xbf16>
    %cst_16 = arith.constant dense<0.000000e+00> : vector<8x128xf32>
    %25 = tpu.matmul %23, %24, %cst_16 {dimension_numbers = #tpu.dot_dimension_numbers<[1], [0], [0], [1], [0, 0, 1, 1], [], []>} : vector<8x128xbf16>, vector<128x128xbf16>, vector<8x128xf32> -> vector<8x128xf32>
    %c0_17 = arith.constant 0 : index
    %c0_18 = arith.constant 0 : index
    %26 = vector.load %arg8[%c0_17, %c0_18] : memref<1x128xf32, #tpu.memory_space<vmem>>, vector<1x128xf32>
    %27 = vector.broadcast %26 : vector<1x128xf32> to vector<8x128xf32>
    %28 = arith.addf %25, %27 : vector<8x128xf32>
    %cst_19 = arith.constant 0.000000e+00 : f32
    %29 = vector.broadcast %cst_19 : f32 to vector<8x128xf32>
    %30 = arith.maximumf %28, %29 : vector<8x128xf32>
    %31 = arith.truncf %30 : vector<8x128xf32> to vector<8x128xbf16>
    %c0_20 = arith.constant 0 : index
    %c0_21 = arith.constant 0 : index
    %32 = vector.load %arg9[%c0_20, %c0_21] : memref<128x1024xbf16, #tpu.memory_space<vmem>>, vector<128x1024xbf16>
    %cst_22 = arith.constant dense<0.000000e+00> : vector<8x1024xf32>
    %33 = tpu.matmul %31, %32, %cst_22 {dimension_numbers = #tpu.dot_dimension_numbers<[1], [0], [0], [1], [0, 0, 1, 1], [], []>} : vector<8x128xbf16>, vector<128x1024xbf16>, vector<8x1024xf32> -> vector<8x1024xf32>
    %c0_23 = arith.constant 0 : index
    %c0_24 = arith.constant 0 : index
    %34 = vector.load %arg10[%c0_23, %c0_24] : memref<1x1024xf32, #tpu.memory_space<vmem>>, vector<1x1024xf32>
    %35 = vector.broadcast %34 : vector<1x1024xf32> to vector<8x1024xf32>
    %36 = arith.addf %33, %35 : vector<8x1024xf32>
    %37 = arith.negf %36 : vector<8x1024xf32>
    %38 = math.exp %37 : vector<8x1024xf32>
    %cst_25 = arith.constant 1.000000e+00 : f32
    %39 = vector.broadcast %cst_25 : f32 to vector<8x1024xf32>
    %40 = arith.addf %39, %38 : vector<8x1024xf32>
    %41 = arith.divf %39, %40 : vector<8x1024xf32>
    %c0_26 = arith.constant 0 : index
    %c0_27 = arith.constant 0 : index
    %42 = vector.load %arg11[%c0_26, %c0_27] : memref<8x1024xf32, #tpu.memory_space<vmem>>, vector<8x1024xf32>
    tpu.vector_store %arg11[%c0_26, %c0_27], %41 {strides = array<i32>} : memref<8x1024xf32, #tpu.memory_space<vmem>>, vector<8x1024xf32>,
    %c0_28 = arith.constant 0 : index
    %c0_29 = arith.constant 0 : index
    %43 = vector.load %arg12[%c0_28, %c0_29] : memref<8x384xf32, #tpu.memory_space<vmem>>, vector<8x128xf32>
    tpu.vector_store %arg12[%c0_28, %c0_29], %22 {strides = array<i32>} : memref<8x384xf32, #tpu.memory_space<vmem>>, vector<8x128xf32>,
    %c0_30 = arith.constant 0 : index
    %c128 = arith.constant 128 : index
    %44 = vector.load %arg12[%c0_30, %c128] : memref<8x384xf32, #tpu.memory_space<vmem>>, vector<8x128xf32>
    tpu.vector_store %arg12[%c0_30, %c128], %16 {strides = array<i32>} : memref<8x384xf32, #tpu.memory_space<vmem>>, vector<8x128xf32>,
    %c0_31 = arith.constant 0 : index
    %c256 = arith.constant 256 : index
    %45 = vector.load %arg12[%c0_31, %c256] : memref<8x384xf32, #tpu.memory_space<vmem>>, vector<8x128xf32>
    tpu.vector_store %arg12[%c0_31, %c256], %17 {strides = array<i32>} : memref<8x384xf32, #tpu.memory_space<vmem>>, vector<8x128xf32>,
    return
  }
  func.func @transform_0(%arg0: i32) -> (i32, i32) {
    %c0_i32 = arith.constant 0 : i32
    %c0_i32_0 = arith.constant 0 : i32
    return %arg0, %c0_i32 : i32, i32
  }
  func.func @transform_1(%arg0: i32) -> (i32, i32) {
    %c0_i32 = arith.constant 0 : i32
    %c0_i32_0 = arith.constant 0 : i32
    return %arg0, %c0_i32 : i32, i32
  }
  func.func @transform_2(%arg0: i32) -> (i32, i32) {
    %c0_i32 = arith.constant 0 : i32
    %c0_i32_0 = arith.constant 0 : i32
    %c0_i32_1 = arith.constant 0 : i32
    return %c0_i32, %c0_i32_0 : i32, i32
  }
  func.func @transform_3(%arg0: i32) -> (i32, i32) {
    %c0_i32 = arith.constant 0 : i32
    %c0_i32_0 = arith.constant 0 : i32
    %c0_i32_1 = arith.constant 0 : i32
    return %c0_i32, %c0_i32_0 : i32, i32
  }
  func.func @transform_4(%arg0: i32) -> (i32, i32) {
    %c0_i32 = arith.constant 0 : i32
    %c0_i32_0 = arith.constant 0 : i32
    %c0_i32_1 = arith.constant 0 : i32
    return %c0_i32, %c0_i32_0 : i32, i32
  }
  func.func @transform_5(%arg0: i32) -> (i32, i32) {
    %c0_i32 = arith.constant 0 : i32
    %c0_i32_0 = arith.constant 0 : i32
    %c0_i32_1 = arith.constant 0 : i32
    return %c0_i32, %c0_i32_0 : i32, i32
  }
  func.func @transform_6(%arg0: i32) -> (i32, i32) {
    %c0_i32 = arith.constant 0 : i32
    %c0_i32_0 = arith.constant 0 : i32
    %c0_i32_1 = arith.constant 0 : i32
    return %c0_i32, %c0_i32_0 : i32, i32
  }
  func.func @transform_7(%arg0: i32) -> (i32, i32) {
    %c0_i32 = arith.constant 0 : i32
    %c0_i32_0 = arith.constant 0 : i32
    %c0_i32_1 = arith.constant 0 : i32
    return %c0_i32, %c0_i32_0 : i32, i32
  }
  func.func @transform_8(%arg0: i32) -> (i32, i32) {
    %c0_i32 = arith.constant 0 : i32
    %c0_i32_0 = arith.constant 0 : i32
    %c0_i32_1 = arith.constant 0 : i32
    return %c0_i32, %c0_i32_0 : i32, i32
  }
  func.func @transform_9(%arg0: i32) -> (i32, i32) {
    %c0_i32 = arith.constant 0 : i32
    %c0_i32_0 = arith.constant 0 : i32
    %c0_i32_1 = arith.constant 0 : i32
    return %c0_i32, %c0_i32_0 : i32, i32
  }
  func.func @transform_10(%arg0: i32) -> (i32, i32) {
    %c0_i32 = arith.constant 0 : i32
    %c0_i32_0 = arith.constant 0 : i32
    return %arg0, %c0_i32 : i32, i32
  }
  func.func @transform_11(%arg0: i32) -> (i32, i32) {
    %c0_i32 = arith.constant 0 : i32
    %c0_i32_0 = arith.constant 0 : i32
    return %arg0, %c0_i32 : i32, i32
  }
}

</mosaic_0001>

<bundles_post_ra>
// kernel: tpu_custom_call.1
= control target key start
LH: loop header
LB: loop body
LE: loop exit
PB: predicated region body
PF: predicated region fallthrough
CT: control target
= control target key end

     0   :  { %17 = vsyncpa [#allocation3], 0  ;;  %s2625_s0 = inlined_call_operand.hbm [shape: f32[8,1024], index: 0, kind: input, shape index: {}]   ;;  %s2626_s1 = inlined_call_operand.hbm [shape: f32[8,128], index: 1, kind: input, shape index: {}]   ;;  %s2627_s2 = inlined_call_operand.hbm [shape: bf16[1024,128], index: 2, kind: input, shape index: {}]   ;;  %s2628_s3 = inlined_call_operand.vmem [shape: f32[1,128], index: 3, kind: input, shape index: {}]   ;;  %s2629_s4 = inlined_call_operand.hbm [shape: bf16[128,256], index: 4, kind: input, shape index: {}]   ;;  %s2630_s5 = inlined_call_operand.vmem [shape: f32[1,256], index: 5, kind: input, shape index: {}]   ;;  %s2631_s6 = inlined_call_operand.hbm [shape: bf16[128,128], index: 6, kind: input, shape index: {}]   ;;  %s2632_s7 = inlined_call_operand.vmem [shape: f32[1,128], index: 7, kind: input, shape index: {}]   ;;  %s2633_s8 = inlined_call_operand.hbm [shape: bf16[128,1024], index: 8, kind: input, shape index: {}]   ;;  %s2634_s9 = inlined_call_operand.vmem [shape: f32[1,1024], index: 9, kind: input, shape index: {}]   ;;  %s2635_s10 = inlined_call_operand.hbm [shape: f32[8,1024], index: 10, kind: output, shape index: {0}]   ;;  %s2636_s11 = inlined_call_operand.hbm [shape: f32[8,384], index: 11, kind: output, shape index: {1}]  }
   0x1   :  { %18 = vsyncpa [#allocation6], 0 }
   0x2   :  { %19 = vsyncpa [#allocation9], 0 }
   0x3   :  { %20 = vsyncpa [#allocation12], 0 }
   0x4   :  { %21 = vsyncpa [#allocation4], 0 }
   0x5   :  { %22 = vsyncpa [#allocation15], 0  ;;  %s2379_s17 = smov [#allocation5]   ;;  %s2380_s19 = smov [#allocation8]  }
   0x6   :  { %s39_s18 = sshll.u32 %s2379_s17, 4  ;;  %s62_s20 = sshll.u32 %s2380_s19, 4  ;;  %s40_s18 = int_to_ptr.vmem [resolvable:$true] %s39_s18  ;;  %s2456_s20 = int_to_ptr.vmem [resolvable:$true] %s62_s20 }
   0x7   :  { %s2191_s23 = scalar_lea.hbm %s2626_s1, 128 }
   0x8   :  { %p2192_p0 = scmp.ne.s32.totalorder %s2626_s1, %s2191_s23  ;;  %p2195_p1 = scmp.lt.u32.totalorder %s2191_s23, %s2626_s1 }
   0xa   :  { %p2197_p2 = pnand %p2195_p1, %p2192_p0 }
   0xc   :  { %2200 = shalt.err (!%p2197_p2)
}
   0xd   :  { %s2201_s28 = scalar_lea.vmem %s40_s18, 128  ;;  %p2206_p4 = scmp.lt.s32.totalorder %s40_s18, %s40_s18 }
   0xe   :  { %p2202_p3 = scmp.ne.s32.totalorder %s40_s18, %s2201_s28  ;;  %p2207_p5 = scmp.lt.s32.totalorder %s2201_s28, %s2201_s28 }
  0x10   :  { %p2208_p6 = por %p2207_p5, %p2206_p4 }
  0x12   :  { %p2209_p7 = pnand %p2208_p6, %p2202_p3 }
  0x14   :  { %2212 = shalt.err (!%p2209_p7)
}
  0x15   :  { %42 = dma.hbm_to_vmem [thread:$0]  %s2626_s1, 128, %s40_s18, [#allocation6]  }
  0x16   :  { %s2213_s14 = scalar_lea.hbm %s2629_s4, 2048 }
  0x17   :  { %p2214_p8 = scmp.ne.s32.totalorder %s2629_s4, %s2213_s14  ;;  %p2217_p9 = scmp.lt.u32.totalorder %s2213_s14, %s2629_s4 }
  0x19   :  { %p2219_p10 = pnand %p2217_p9, %p2214_p8 }
  0x1b   :  { %2222 = shalt.err (!%p2219_p10)
}
  0x1c   :  { %s2223_s21 = scalar_lea.vmem %s2456_s20, 2048  ;;  %p2228_p12 = scmp.lt.s32.totalorder %s2456_s20, %s2456_s20 }
  0x1d   :  { %p2224_p11 = scmp.ne.s32.totalorder %s2456_s20, %s2223_s21  ;;  %p2229_p13 = scmp.lt.s32.totalorder %s2223_s21, %s2223_s21 }
  0x1f   :  { %p2230_p0 = por %p2229_p13, %p2228_p12 }
  0x21   :  { %p2231_p1 = pnand %p2230_p0, %p2224_p11 }
  0x23   :  { %2234 = shalt.err (!%p2231_p1)
}
  0x24   :  { %s2381_s1 = smov 128   ;;  %s2382_s18 = smov 8  }
  0x25   :  { %68 = dma.hbm_to_vmem [thread:$0]  %s2629_s4, 2048, %s2456_s20, [#allocation9], %s2381_s1, %s2381_s1, %s2382_s18  }
  0x26   :  { %s2383_s24 = smov [#allocation2]   ;;  %s2384_s26 = smov [#allocation7]  }
  0x27   :  { %s29_s25 = sshll.u32 %s2383_s24, 4  ;;  %s48_s27 = sshll.u32 %s2384_s26, 4  ;;  %s30_s25 = int_to_ptr.vmem [resolvable:$true] %s29_s25  ;;  %s2487_s27 = int_to_ptr.vmem [resolvable:$true] %s48_s27 }
  0x28   :  { %s2235_s30 = scalar_lea.hbm %s2625_s0, 1024 }
  0x29   :  { %p2236_p2 = scmp.ne.s32.totalorder %s2625_s0, %s2235_s30  ;;  %p2239_p3 = scmp.lt.u32.totalorder %s2235_s30, %s2625_s0 }
  0x2b   :  { %p2241_p4 = pnand %p2239_p3, %p2236_p2 }
  0x2d   :  { %2244 = shalt.err (!%p2241_p4)
}
  0x2e   :  { %s2245_s4 = scalar_lea.vmem %s30_s25, 1024  ;;  %p2250_p6 = scmp.lt.s32.totalorder %s30_s25, %s30_s25 }
  0x2f   :  { %p2246_p5 = scmp.ne.s32.totalorder %s30_s25, %s2245_s4  ;;  %p2251_p7 = scmp.lt.s32.totalorder %s2245_s4, %s2245_s4 }
  0x31   :  { %p2252_p8 = por %p2251_p7, %p2250_p6 }
  0x33   :  { %p2253_p9 = pnand %p2252_p8, %p2246_p5 }
  0x35   :  { %2256 = shalt.err (!%p2253_p9)
}
  0x36   :  { %32 = dma.hbm_to_vmem [thread:$0]  %s2625_s0, 1024, %s30_s25, [#allocation3]  }
  0x37   :  { %s2257_s21 = scalar_lea.hbm %s2627_s2, 8192 }
  0x38   :  { %p2258_p10 = scmp.ne.s32.totalorder %s2627_s2, %s2257_s21  ;;  %p2261_p11 = scmp.lt.u32.totalorder %s2257_s21, %s2627_s2 }
  0x3a   :  { %p2263_p12 = pnand %p2261_p11, %p2258_p10 }
  0x3c   :  { %2266 = shalt.err (!%p2263_p12)
}
  0x3d   :  { %s2267_s24 = scalar_lea.vmem %s2487_s27, 8192  ;;  %p2272_p0 = scmp.lt.s32.totalorder %s2487_s27, %s2487_s27 }
  0x3e   :  { %p2268_p13 = scmp.ne.s32.totalorder %s2487_s27, %s2267_s24  ;;  %p2273_p1 = scmp.lt.s32.totalorder %s2267_s24, %s2267_s24 }
  0x40   :  { %p2274_p2 = por %p2273_p1, %p2272_p0 }
  0x42   :  { %p2275_p3 = pnand %p2274_p2, %p2268_p13 }
  0x44   :  { %2278 = shalt.err (!%p2275_p3)
}
  0x45   :  { %s2385_s0 = smov 64   ;;  %s2386_s25 = smov 4  }
  0x46   :  { %54 = dma.hbm_to_vmem [thread:$0]  %s2627_s2, 8192, %s2487_s27, [#allocation6], %s2385_s0, %s2385_s0, %s2386_s25  }
  0x47   :  { %s2387_s29 = smov [#allocation10]   ;;  %s2388_s12 = smov [#allocation11]  }
  0x48   :  { %s76_s30 = sshll.u32 %s2387_s29, 4  ;;  %s90_s13 = sshll.u32 %s2388_s12, 4  ;;  %s77_s30 = int_to_ptr.vmem [resolvable:$true] %s76_s30  ;;  %s2518_s13 = int_to_ptr.vmem [resolvable:$true] %s90_s13 }
  0x49   :  { %s2279_s4 = scalar_lea.hbm %s2631_s6, 1024 }
  0x4a   :  { %p2280_p4 = scmp.ne.s32.totalorder %s2631_s6, %s2279_s4  ;;  %p2283_p5 = scmp.lt.u32.totalorder %s2279_s4, %s2631_s6 }
  0x4c   :  { %p2285_p6 = pnand %p2283_p5, %p2280_p4 }
  0x4e   :  { %2288 = shalt.err (!%p2285_p6)
}
  0x4f   :  { %s2289_s2 = scalar_lea.vmem %s77_s30, 1024  ;;  %p2294_p8 = scmp.lt.s32.totalorder %s77_s30, %s77_s30 }
  0x50   :  { %p2290_p7 = scmp.ne.s32.totalorder %s77_s30, %s2289_s2  ;;  %p2295_p9 = scmp.lt.s32.totalorder %s2289_s2, %s2289_s2 }
  0x52   :  { %p2296_p10 = por %p2295_p9, %p2294_p8 }
  0x54   :  { %p2297_p11 = pnand %p2296_p10, %p2290_p7 }
  0x56   :  { %2300 = shalt.err (!%p2297_p11)
}
  0x57   :  { %82 = dma.hbm_to_vmem [thread:$0]  %s2631_s6, 1024, %s77_s30, [#allocation9], %s2385_s0, %s2385_s0, %s2386_s25  }
  0x58   :  { %s2301_s22 = scalar_lea.hbm %s2633_s8, 8192 }
  0x59   :  { %p2302_p12 = scmp.ne.s32.totalorder %s2633_s8, %s2301_s22  ;;  %p2305_p13 = scmp.lt.u32.totalorder %s2301_s22, %s2633_s8 }
  0x5b   :  { %p2307_p0 = pnand %p2305_p13, %p2302_p12 }
  0x5d   :  { %2310 = shalt.err (!%p2307_p0)
}
  0x5e   :  { %s2311_s29 = scalar_lea.vmem %s2518_s13, 8192  ;;  %p2316_p2 = scmp.lt.s32.totalorder %s2518_s13, %s2518_s13 }
  0x5f   :  { %p2312_p1 = scmp.ne.s32.totalorder %s2518_s13, %s2311_s29  ;;  %p2317_p3 = scmp.lt.s32.totalorder %s2311_s29, %s2311_s29 }
  0x61   :  { %p2318_p4 = por %p2317_p3, %p2316_p2 }
  0x63   :  { %p2319_p5 = pnand %p2318_p4, %p2312_p1 }
  0x65   :  { %2322 = shalt.err (!%p2319_p5)
}
  0x66   :  { %s2389_s6 = smov 512   ;;  %s2390_s0 = smov 32  }
  0x67   :  { %96 = dma.hbm_to_vmem [thread:$0]  %s2633_s8, 8192, %s2518_s13, [#allocation12], %s2389_s6, %s2389_s6, %s2390_s0  }
  0x68   :  { %2367 = dma.done.wait [#allocation3], 1024  }
  0x69   :  { %2368 = vsyncadd [#allocation3], 4294966272 }
  0x6a   :  { %2369 = dma.done.wait [#allocation6], 8320  }
  0x6b   :  { %2370 = vsyncadd [#allocation6], 4294958976 }
  0x6c   :  { %2371 = dma.done.wait [#allocation9], 3072  }
  0x6d   :  { %2372 = vsyncadd [#allocation9], 4294964224 }
  0x6e   :  { %2373 = dma.done.wait [#allocation12], 8192  }
  0x6f   :  { %2374 = vsyncadd [#allocation12], 4294959104  ;;  %v2061_v0 = vld [vmem:[#allocation7 + $0x40] sm:$0xff]   ;;  %v2065_v4 = vld [vmem:[#allocation7 + $0x48] sm:$0xff]   ;;  %vm2393_vm0 = vmmov 0  }
  0x70   :  { %v2062_v1 = vld [vmem:[#allocation7 + $0xc0] sm:$0xff]   ;;  %1927 = vmatprep.subr.bf16.mxu0 %v2061_v0  ;;  %v2066_v5 = vld [vmem:[#allocation7 + $0xc8] sm:$0xff]   ;;  %v2069_v8 = vld [vmem:[#allocation7 + $0x50] sm:$0xff]  }
  0x71   :  { %v2063_v2 = vld [vmem:[#allocation7] sm:$0xff]   ;;  %1949 = vmatprep.subr.bf16.mxu1 %v2062_v1  ;;  %v2067_v6 = vld [vmem:[#allocation7 + $0x8] sm:$0xff]   ;;  %v2070_v9 = vld [vmem:[#allocation7 + $0xd0] sm:$0xff]  }
  0x72   :  { %v2064_v3 = vld [vmem:[#allocation7 + $0x80] sm:$0xff]   ;;  %1928 = vmatpush3.bf16.msra.mxu0 %v2063_v2  ;;  %v2068_v7 = vld [vmem:[#allocation7 + $0x88] sm:$0xff]   ;;  %v2071_v10 = vld [vmem:[#allocation7 + $0x10] sm:$0xff]  }
  0x73   :  { %1950 = vmatpush3.bf16.msra.mxu1 %v2064_v3  ;;  %1929 = vmatprep.subr.bf16.mxu0 %v2065_v4  ;;  %v2072_v11 = vld [vmem:[#allocation7 + $0x90] sm:$0xff]   ;;  %v2073_v12 = vld [vmem:[#allocation7 + $0x58] sm:$0xff]   ;;  %v2077_v16 = vld [vmem:[#allocation7 + $0x60] sm:$0xff]  }
  0x74   :  { %1951 = vmatprep.subr.bf16.mxu1 %v2066_v5  ;;  %v2074_v13 = vld [vmem:[#allocation7 + $0xd8] sm:$0xff]   ;;  %v2078_v17 = vld [vmem:[#allocation7 + $0xe0] sm:$0xff]   ;;  %v2081_v20 = vld [vmem:[#allocation7 + $0x68] sm:$0xff]  }
  0x75   :  { %v2075_v14 = vld [vmem:[#allocation7 + $0x18] sm:$0xff]   ;;  %v2079_v18 = vld [vmem:[#allocation7 + $0x20] sm:$0xff]   ;;  %v2082_v21 = vld [vmem:[#allocation7 + $0xe8] sm:$0xff]  }
  0x76   :  { %1930 = vmatpush3.bf16.msra.mxu0 %v2067_v6  ;;  %v2076_v15 = vld [vmem:[#allocation7 + $0x98] sm:$0xff]   ;;  %v2080_v19 = vld [vmem:[#allocation7 + $0xa0] sm:$0xff]   ;;  %v2083_v22 = vld [vmem:[#allocation7 + $0x28] sm:$0xff]  }
  0x77   :  { %1952 = vmatpush3.bf16.msra.mxu1 %v2068_v7  ;;  %1931 = vmatprep.subr.bf16.mxu0 %v2069_v8  ;;  %v2084_v23 = vld [vmem:[#allocation7 + $0xa8] sm:$0xff]   ;;  %v2085_v24 = vld [vmem:[#allocation7 + $0x70] sm:$0xff]   ;;  %v2089_v28 = vld [vmem:[#allocation7 + $0x78] sm:$0xff]  }
  0x78   :  { %1953 = vmatprep.subr.bf16.mxu1 %v2070_v9  ;;  %v2086_v25 = vld [vmem:[#allocation7 + $0xf0] sm:$0xff]   ;;  %v2090_v29 = vld [vmem:[#allocation7 + $0xf8] sm:$0xff]   ;;  %v119_v32 = vld [vmem:[#allocation2 + $0x8] sm:$0xff] }
  0x79   :  { %v2087_v26 = vld [vmem:[#allocation7 + $0x30] sm:$0xff]   ;;  %v2091_v30 = vld [vmem:[#allocation7 + $0x38] sm:$0xff]   ;;  %v128_v35 = vpack.c.bf16 %v119_v32, %v119_v32  ;;  %v120_v38 = vld [vmem:[#allocation2 + $0x10] sm:$0xff]  ;;  %v2391_v32 = vmov 0  }
  0x7a   :  { %1932 = vmatpush3.bf16.msra.mxu0 %v2071_v10  ;;  %v2088_v27 = vld [vmem:[#allocation7 + $0xb0] sm:$0xff]   ;;  %v2092_v31 = vld [vmem:[#allocation7 + $0xb8] sm:$0xff]   ;;  %v129_v39 = vpack.c.bf16 %v120_v38, %v120_v38  ;;  %v2093_v40 = vld [vmem:[#allocation7 + $0x140] sm:$0xff]  }
  0x7b   :  { %1954 = vmatpush3.bf16.msra.mxu1 %v2072_v11  ;;  %1933 = vmatprep.subr.bf16.mxu0 %v2073_v12  ;;  %v121_v33 = vld [vmem:[#allocation2 + $0x18] sm:$0xff]  ;;  %v118_v34 = vld [vmem:[#allocation2] sm:$0xff]  ;;  %v2094_v41 = vld [vmem:[#allocation7 + $0x1c0] sm:$0xff]  }
  0x7c   :  { %1955 = vmatprep.subr.bf16.mxu1 %v2074_v13  ;;  %v130_v36 = vpack.c.bf16 %v121_v33, %v121_v33  ;;  %v127_v37 = vpack.c.bf16 %v118_v34, %v118_v34  ;;  %686 = vmatprep.mubr.bf16.mxu0 %v128_v35  ;;  %v2095_v42 = vld [vmem:[#allocation7 + $0x100] sm:$0xff]   ;;  %v2097_v44 = vld [vmem:[#allocation7 + $0x148] sm:$0xff]   ;;  %v2101_v48 = vld [vmem:[#allocation7 + $0x150] sm:$0xff]   ;;  %v2392_v34 = vmov 0.0  }
  0x7d   :  { %v2096_v43 = vld [vmem:[#allocation7 + $0x180] sm:$0xff]   ;;  %v2098_v45 = vld [vmem:[#allocation7 + $0x1c8] sm:$0xff]   ;;  %v2102_v49 = vld [vmem:[#allocation7 + $0x1d0] sm:$0xff]  }
  0x7e   :  { %1934 = vmatpush3.bf16.msra.mxu0 %v2075_v14  ;;  %726 = vmatprep.mubr.bf16.mxu1 %v130_v36  ;;  %v2099_v46 = vld [vmem:[#allocation7 + $0x108] sm:$0xff]   ;;  %v2103_v50 = vld [vmem:[#allocation7 + $0x110] sm:$0xff]   ;;  %v2105_v52 = vld [vmem:[#allocation7 + $0x158] sm:$0xff]  }
  0x7f   :  { %1956 = vmatpush3.bf16.msra.mxu1 %v2076_v15  ;;  %1935 = vmatprep.subr.bf16.mxu0 %v2077_v16  ;;  %v2100_v47 = vld [vmem:[#allocation7 + $0x188] sm:$0xff]   ;;  %v2104_v51 = vld [vmem:[#allocation7 + $0x190] sm:$0xff]   ;;  %v2106_v53 = vld [vmem:[#allocation7 + $0x1d8] sm:$0xff]  }
  0x80   :  { %1957 = vmatprep.subr.bf16.mxu1 %v2078_v17  ;;  %v2107_v54 = vld [vmem:[#allocation7 + $0x118] sm:$0xff]   ;;  %v2109_v56 = vld [vmem:[#allocation7 + $0x160] sm:$0xff]   ;;  %v2113_v60 = vld [vmem:[#allocation7 + $0x168] sm:$0xff]  }
  0x81   :  { %v2108_v55 = vld [vmem:[#allocation7 + $0x198] sm:$0xff]   ;;  %v2110_v57 = vld [vmem:[#allocation7 + $0x1e0] sm:$0xff]   ;;  %v2114_v61 = vld [vmem:[#allocation7 + $0x1e8] sm:$0xff]  }
  0x82   :  { %1936 = vmatpush3.bf16.msra.mxu0 %v2079_v18  ;;  %v2111_v58 = vld [vmem:[#allocation7 + $0x120] sm:$0xff]   ;;  %v2115_v62 = vld [vmem:[#allocation7 + $0x128] sm:$0xff]   ;;  %v2117_v0 = vld [vmem:[#allocation7 + $0x170] sm:$0xff]  }
  0x83   :  { %1958 = vmatpush3.bf16.msra.mxu1 %v2080_v19  ;;  %1937 = vmatprep.subr.bf16.mxu0 %v2081_v20  ;;  %v2112_v59 = vld [vmem:[#allocation7 + $0x1a0] sm:$0xff]   ;;  %v2116_v63 = vld [vmem:[#allocation7 + $0x1a8] sm:$0xff]   ;;  %v2118_v1 = vld [vmem:[#allocation7 + $0x1f0] sm:$0xff]  }
  0x84   :  { %1959 = vmatprep.subr.bf16.mxu1 %v2082_v21  ;;  %v2119_v2 = vld [vmem:[#allocation7 + $0x130] sm:$0xff]   ;;  %v2121_v4 = vld [vmem:[#allocation7 + $0x178] sm:$0xff]   ;;  %v123_v8 = vld [vmem:[#allocation2 + $0x28] sm:$0xff] }
  0x85   :  { %v2120_v3 = vld [vmem:[#allocation7 + $0x1b0] sm:$0xff]   ;;  %v2122_v5 = vld [vmem:[#allocation7 + $0x1f8] sm:$0xff]   ;;  %v132_v10 = vpack.c.bf16 %v123_v8, %v123_v8  ;;  %v124_v13 = vld [vmem:[#allocation2 + $0x30] sm:$0xff] }
  0x86   :  { %1938 = vmatpush3.bf16.msra.mxu0 %v2083_v22  ;;  %v2123_v6 = vld [vmem:[#allocation7 + $0x138] sm:$0xff]   ;;  %v125_v9 = vld [vmem:[#allocation2 + $0x38] sm:$0xff]  ;;  %v133_v15 = vpack.c.bf16 %v124_v13, %v124_v13  ;;  %v2125_v16 = vld [vmem:[#allocation8] ss:$8 sps:$4 sm:$0xff]  }
  0x87   :  { %1960 = vmatpush3.bf16.msra.mxu1 %v2084_v23  ;;  %1939 = vmatprep.subr.bf16.mxu0 %v2085_v24  ;;  %v2124_v7 = vld [vmem:[#allocation7 + $0x1b8] sm:$0xff]   ;;  %v134_v11 = vpack.c.bf16 %v125_v9, %v125_v9  ;;  %v2127_v17 = vld [vmem:[#allocation8 + $0x4] ss:$8 sps:$4 sm:$0xff]   ;;  %v2131_v21 = vld [vmem:[#allocation8 + $0x20] ss:$8 sps:$4 sm:$0xff]  }
  0x88   :  { %1961 = vmatprep.subr.bf16.mxu1 %v2086_v25  ;;  %v122_v12 = vld [vmem:[#allocation2 + $0x20] sm:$0xff]  ;;  %v2133_v20 = vld [vmem:[#allocation8 + $0x24] ss:$8 sps:$4 sm:$0xff]   ;;  %v2137_v25 = vld [vmem:[#allocation8 + $0x40] ss:$8 sps:$4 sm:$0xff]  }
  0x89   :  { %v131_v14 = vpack.c.bf16 %v122_v12, %v122_v12  ;;  %v2130_v18 = vld [vmem:[#allocation8 + $0x14] ss:$8 sps:$4 sm:$0xff]   ;;  %v2128_v19 = vld [vmem:[#allocation8 + $0x10] ss:$8 sps:$4 sm:$0xff]   ;;  %v2139_v24 = vld [vmem:[#allocation8 + $0x44] ss:$8 sps:$4 sm:$0xff]  }
  0x8a   :  { %1940 = vmatpush3.bf16.msra.mxu0 %v2087_v26  ;;  %v2136_v22 = vld [vmem:[#allocation8 + $0x34] ss:$8 sps:$4 sm:$0xff]   ;;  %v2134_v23 = vld [vmem:[#allocation8 + $0x30] ss:$8 sps:$4 sm:$0xff]   ;;  %v2149_v33 = vld [vmem:[#allocation10] sm:$0xff]  }
  0x8b   :  { %1962 = vmatpush3.bf16.msra.mxu1 %v2088_v27  ;;  %1941 = vmatprep.subr.bf16.mxu0 %v2089_v28  ;;  %v2142_v26 = vld [vmem:[#allocation8 + $0x54] ss:$8 sps:$4 sm:$0xff]   ;;  %v2140_v27 = vld [vmem:[#allocation8 + $0x50] ss:$8 sps:$4 sm:$0xff]   ;;  %v2145_v28 = vld [vmem:[#allocation8 + $0x64] ss:$8 sps:$4 sm:$0xff]  }
  0x8c   :  { %1963 = vmatprep.subr.bf16.mxu1 %v2090_v29  ;;  %v2143_v29 = vld [vmem:[#allocation8 + $0x60] ss:$8 sps:$4 sm:$0xff]   ;;  %v1765_v38 = vld [vmem:[%s2628_s3] ss:$0 sm:$0xff] }
  0x8d   :  { %v2150_v35 = vld [vmem:[#allocation10 + $0x8] sm:$0xff]   ;;  %v1096_v12 = vld [vmem:[#allocation11 + $0x60] sm:$0xff] }
  0x8e   :  { %1942 = vmatpush3.bf16.msra.mxu0 %v2091_v30  ;;  %v2148_v30 = vld [vmem:[#allocation8 + $0x74] ss:$8 sps:$4 sm:$0xff]  }
  0x8f   :  { %1964 = vmatpush3.bf16.msra.mxu1 %v2092_v31  ;;  %1971 = vmatprep.subr.bf16.mxu0 %v2093_v40  ;;  %v2146_v31 = vld [vmem:[#allocation8 + $0x70] ss:$8 sps:$4 sm:$0xff]  }
  0x90   :  { %1993 = vmatprep.subr.bf16.mxu1 %v2094_v41 }
  0x91   :  { %687 = vmatmul.mubr.bf16.vlgmr.msra.gmra.mrb[0].mxu0 %v127_v37 }
  0x92   :  { %727 = vmatmul.mubr.bf16.vlgmr.msra.gmra.mrb[0].mxu1 %v129_v39  ;;  %1972 = vmatpush3.bf16.msra.mxu0 %v2095_v42 }
  0x93   :  { %1994 = vmatpush3.bf16.msra.mxu1 %v2096_v43  ;;  %1973 = vmatprep.subr.bf16.mxu0 %v2097_v44 }
  0x94   :  { %1995 = vmatprep.subr.bf16.mxu1 %v2098_v45  ;;  %766 = vmatprep.mubr.bf16.mxu0 %v132_v10  ;;  %v2556_v10 = vld [vmem:[#allocation11 + $0x28] sm:$0xff] }
  0x95   :  { %806 = vmatprep.mubr.bf16.mxu1 %v134_v11  ;;  %v1092_v11 = vld [vmem:[#allocation11 + $0x40] sm:$0xff] }
  0x96   :  { %1974 = vmatpush3.bf16.msra.mxu0 %v2099_v46 }
  0x97   :  { %1996 = vmatpush3.bf16.msra.mxu1 %v2100_v47  ;;  %1975 = vmatprep.subr.bf16.mxu0 %v2101_v48 }
  0x98   :  { %1997 = vmatprep.subr.bf16.mxu1 %v2102_v49 }
  0x9a   :  { %1976 = vmatpush3.bf16.msra.mxu0 %v2103_v50 }
  0x9b   :  { %1998 = vmatpush3.bf16.msra.mxu1 %v2104_v51  ;;  %1977 = vmatprep.subr.bf16.mxu0 %v2105_v52 }
  0x9c   :  { %1999 = vmatprep.subr.bf16.mxu1 %v2106_v53 }
  0x9e   :  { %1978 = vmatpush3.bf16.msra.mxu0 %v2107_v54 }
  0x9f   :  { %2000 = vmatpush3.bf16.msra.mxu1 %v2108_v55  ;;  %1979 = vmatprep.subr.bf16.mxu0 %v2109_v56 }
  0xa0   :  { %2001 = vmatprep.subr.bf16.mxu1 %v2110_v57 }
  0xa2   :  { %1980 = vmatpush3.bf16.msra.mxu0 %v2111_v58 }
  0xa3   :  { %2002 = vmatpush3.bf16.msra.mxu1 %v2112_v59  ;;  %1981 = vmatprep.subr.bf16.mxu0 %v2113_v60 }
  0xa4   :  { %2003 = vmatprep.subr.bf16.mxu1 %v2114_v61 }
  0xa6   :  { %1982 = vmatpush3.bf16.msra.mxu0 %v2115_v62 }
  0xa7   :  { %2004 = vmatpush3.bf16.msra.mxu1 %v2116_v63  ;;  %1983 = vmatprep.subr.bf16.mxu0 %v2117_v0  ;;  %v2151_v63 = vld [vmem:[#allocation10 + $0x10] sm:$0xff]   ;;  %v2152_v0 = vld [vmem:[#allocation10 + $0x18] sm:$0xff]  }
  0xa8   :  { %2005 = vmatprep.subr.bf16.mxu1 %v2118_v1  ;;  %v2153_v1 = vld [vmem:[#allocation10 + $0x20] sm:$0xff]  }
  0xaa   :  { %1984 = vmatpush3.bf16.msra.mxu0 %v2119_v2  ;;  %v2154_v2 = vld [vmem:[#allocation10 + $0x28] sm:$0xff]  }
  0xab   :  { %2006 = vmatpush3.bf16.msra.mxu1 %v2120_v3  ;;  %1985 = vmatprep.subr.bf16.mxu0 %v2121_v4  ;;  %v2155_v3 = vld [vmem:[#allocation10 + $0x30] sm:$0xff]   ;;  %v2156_v4 = vld [vmem:[#allocation10 + $0x38] sm:$0xff]  }
  0xac   :  { %2007 = vmatprep.subr.bf16.mxu1 %v2122_v5  ;;  %v1084_v5 = vld [vmem:[#allocation11] sm:$0xff] }
  0xae   :  { %1986 = vmatpush3.bf16.msra.mxu0 %v2123_v6  ;;  %v1088_v6 = vld [vmem:[#allocation11 + $0x20] sm:$0xff] }
  0xaf   :  { %2008 = vmatpush3.bf16.msra.mxu1 %v2124_v7  ;;  %924 = vmatprep.subr.bf16.mxu0 %v2127_v17  ;;  %v2554_v7 = vld [vmem:[#allocation11 + $0x8] sm:$0xff]  ;;  %v1855_v8 = vcombine.low %v1084_v5, %v1088_v6  ;;  %v1856_v9 = vcombine.high %v1084_v5, %v1088_v6  ;;  %v1100_v17 = vld [vmem:[#allocation11 + $0x80] sm:$0xff] }
  0xb0   :  { %2024 = vmatprep.subr.bf16.mxu1 %v2392_v34  ;;  %v1857_v13 = vcombine.low %v2554_v7, %v2556_v10  ;;  %v1117_v5 = vld [vmem:[#allocation11 + $0x108] sm:$0xff] }
  0xb1   :  { %767 = vmatmul.mubr.bf16.vlgmr.msra.gmra.mrb[4].mxu0 %v131_v14  ;;  %v1858_v14 = vcombine.high %v2554_v7, %v2556_v10  ;;  %v1121_v6 = vld [vmem:[#allocation11 + $0x128] sm:$0xff] }
  0xb2   :  { %807 = vmatmul.mubr.bf16.vlgmr.msra.gmra.mrb[4].mxu1 %v133_v15  ;;  %925 = vmatpush1.bf16.msra.mxu0 %v2125_v16  ;;  %v1864_v15 = vcombine.high %v1092_v11, %v1096_v12  ;;  %v1863_v16 = vcombine.low %v1092_v11, %v1096_v12  ;;  %v1125_v11 = vld [vmem:[#allocation11 + $0x148] sm:$0xff]  ;;  %v1889_v10 = vcombine.low %v1117_v5, %v1121_v6 }
  0xb3   :  { %926 = vmatprep.subr.bf16.mxu0 %v2130_v18  ;;  %956 = vmatprep.mubr.bf16.mxu0 %v2391_v32  ;;  %v1104_v18 = vld [vmem:[#allocation11 + $0xa0] sm:$0xff]  ;;  %v1129_v7 = vld [vmem:[#allocation11 + $0x168] sm:$0xff] }
  0xb4   :  { %2025 = vmatpush3.bf16.msra.mxu1 %v2149_v33  ;;  %2040 = vmatprep.mubr.msk.bf16.mxu1 %vm2393_vm0, %v2392_v34  ;;  %v1898_v12 = vcombine.high %v1125_v11, %v1129_v7 }
  0xb5   :  { %2026 = vmatprep.subr.bf16.mxu1 %v2392_v34 }
  0xb6   :  { %927 = vmatpush1.bf16.msra.mxu0 %v2128_v19  ;;  %v1872_v19 = vcombine.high %v1100_v17, %v1104_v18 }
  0xb7   :  { %928 = vmatprep.subr.bf16.mxu0 %v2133_v20  ;;  %v1871_v20 = vcombine.low %v1100_v17, %v1104_v18  ;;  %v1140_v18 = vld [vmem:[#allocation11 + $0x1c0] sm:$0xff] }
  0xb8   :  { %2027 = vmatpush3.bf16.msra.mxu1 %v2150_v35  ;;  %v1136_v35 = vld [vmem:[#allocation11 + $0x1a0] sm:$0xff] }
  0xb9   :  { %2028 = vmatprep.subr.bf16.mxu1 %v2392_v34 }
  0xba   :  { %929 = vmatpush1.bf16.msra.mxu0 %v2131_v21  ;;  %v1108_v21 = vld [vmem:[#allocation11 + $0xc0] sm:$0xff] }
  0xbb   :  { %930 = vmatprep.subr.bf16.mxu0 %v2136_v22  ;;  %v1112_v22 = vld [vmem:[#allocation11 + $0xe0] sm:$0xff] }
  0xbc   :  { %2029 = vmatpush3.bf16.msra.mxu1 %v2151_v63 }
  0xbd   :  { %2030 = vmatprep.subr.bf16.mxu1 %v2392_v34 }
  0xbe   :  { %931 = vmatpush1.bf16.msra.mxu0 %v2134_v23  ;;  %v1880_v23 = vcombine.high %v1108_v21, %v1112_v22 }
  0xbf   :  { %932 = vmatprep.subr.bf16.mxu0 %v2139_v24  ;;  %v1879_v24 = vcombine.low %v1108_v21, %v1112_v22  ;;  %v1145_v22 = vld [vmem:[#allocation11 + $0x1e8] sm:$0xff] }
  0xc0   :  { %2031 = vmatpush3.bf16.msra.mxu1 %v2152_v0 }
  0xc1   :  { %2032 = vmatprep.subr.bf16.mxu1 %v2392_v34 }
  0xc2   :  { %933 = vmatpush1.bf16.msra.mxu0 %v2137_v25  ;;  %v1116_v25 = vld [vmem:[#allocation11 + $0x100] sm:$0xff] }
  0xc3   :  { %934 = vmatprep.subr.bf16.mxu0 %v2142_v26  ;;  %v1120_v26 = vld [vmem:[#allocation11 + $0x120] sm:$0xff] }
  0xc4   :  { %2033 = vmatpush3.bf16.msra.mxu1 %v2153_v1  ;;  %v1109_v1 = vld [vmem:[#allocation11 + $0xc8] sm:$0xff] }
  0xc5   :  { %2034 = vmatprep.subr.bf16.mxu1 %v2392_v34 }
  0xc6   :  { %935 = vmatpush1.bf16.msra.mxu0 %v2140_v27  ;;  %v1888_v27 = vcombine.high %v1116_v25, %v1120_v26 }
  0xc7   :  { %936 = vmatprep.subr.bf16.mxu0 %v2145_v28  ;;  %v1887_v28 = vcombine.low %v1116_v25, %v1120_v26  ;;  %v1086_v26 = vld [vmem:[#allocation11 + $0x10] sm:$0xff] }
  0xc8   :  { %2035 = vmatpush3.bf16.msra.mxu1 %v2154_v2  ;;  %v1113_v2 = vld [vmem:[#allocation11 + $0xe8] sm:$0xff] }
  0xc9   :  { %2036 = vmatprep.subr.bf16.mxu1 %v2392_v34 }
  0xca   :  { %937 = vmatpush1.bf16.msra.mxu0 %v2143_v29  ;;  %v1124_v29 = vld [vmem:[#allocation11 + $0x140] sm:$0xff] }
  0xcb   :  { %938 = vmatprep.subr.bf16.mxu0 %v2148_v30  ;;  %v1128_v30 = vld [vmem:[#allocation11 + $0x160] sm:$0xff] }
  0xcc   :  { %2037 = vmatpush3.bf16.msra.mxu1 %v2155_v3  ;;  %v1895_v33 = vcombine.low %v1124_v29, %v1128_v30 }
  0xcd   :  { %2038 = vmatprep.subr.bf16.mxu1 %v2392_v34  ;;  %v1132_v34 = vld [vmem:[#allocation11 + $0x180] sm:$0xff] }
  0xce   :  { %939 = vmatpush1.bf16.msra.mxu0 %v2146_v31  ;;  %v1896_v31 = vcombine.high %v1124_v29, %v1128_v30 }
  0xcf   :  { %1510 = vmatprep.subr.bf16.mxu0 %v1856_v9  ;;  %v1890_v9 = vcombine.high %v1117_v5, %v1121_v6  ;;  %v1122_v5 = vld [vmem:[#allocation11 + $0x130] sm:$0xff]  ;;  %v1119_v6 = vld [vmem:[#allocation11 + $0x118] sm:$0xff] }
  0xd0   :  { %2039 = vmatpush3.bf16.msra.mxu1 %v2156_v4  ;;  %v1882_v4 = vcombine.high %v1109_v1, %v1113_v2 }
  0xd1   :  { %1551 = vmatprep.subr.bf16.mxu1 %v1858_v14  ;;  %v1137_v14 = vld [vmem:[#allocation11 + $0x1a8] sm:$0xff] }
 0x164   :  { %v1943_v36 = vpop.f32.mrb[0].mxu0 }
 0x165   :  { %v1965_v37 = vpop.f32.mrb[0].mxu1  ;;  %v1944_v39 = vpop.f32.mrb[1].mxu0 }
 0x166   :  { %v1966_v40 = vpop.f32.mrb[1].mxu1  ;;  %v1945_v41 = vadd.f32 %v1944_v39, %v1943_v36  ;;  %v1946_v43 = vpop.f32.mrb[2].mxu0  ;;  %v1904_v36 = vcombine.high %v1132_v34, %v1136_v35 }
 0x167   :  { %v1967_v42 = vadd.f32 %v1966_v40, %v1965_v37  ;;  %v1968_v44 = vpop.f32.mrb[2].mxu1  ;;  %v1947_v45 = vpop.f32.mrb[3].mxu0  ;;  %v1903_v37 = vcombine.low %v1132_v34, %v1136_v35  ;;  %v1846_v35 = vld [vmem:[%s2632_s7] ss:$0 sm:$0xff]  ;;  %s2394_s7 = smov [#allocation14]  }
 0x168   :  { %v1969_v46 = vpop.f32.mrb[3].mxu1  ;;  %v689_v47 = vadd.f32 %v1945_v41, %v1765_v38  ;;  %v834_v38 = vlaneseq  ;;  %v832_v41 = vld [vmem:[%s2630_s5] sm:$0x3]  ;;  %s1749_s15 = sshll.u32 %s2394_s7, 4  ;;  %s1750_s15 = int_to_ptr.vmem [resolvable:$true] %s1749_s15 }
 0x169   :  { %s2323_s4 = scalar_lea.vmem %s1750_s15, 384  ;;  %p2328_p7 = scmp.lt.s32.totalorder %s1750_s15, %s1750_s15 }
 0x16a   :  { %v729_v48 = vadd.f32 %v1967_v42, %v689_v47  ;;  %v2562_v39 = vshrl.u32 %v834_v38, 7  ;;  %p2324_p6 = scmp.ne.s32.totalorder %s1750_s15, %s2323_s4  ;;  %p2329_p8 = scmp.lt.s32.totalorder %s2323_s4, %s2323_s4 }
 0x16c   :  { %v836_v40 = vsub.s32 0, %v2562_v39  ;;  %v840_v42 = vsub.s32 1, %v2562_v39  ;;  %p2330_p9 = por %p2329_p8, %p2328_p7 }
 0x16e   :  { %v837_v43 = vrot.slane %v832_v41, %v836_v40  ;;  %v841_v44 = vrot.slane %v832_v41, %v840_v42  ;;  %v1094_v41 = vld [vmem:[#allocation11 + $0x50] sm:$0xff]  ;;  %p2331_p10 = pnand %p2330_p9, %p2324_p6 }
 0x184   :  { %v1987_v49 = vpop.f32.mrb[4].mxu0 }
 0x185   :  { %v2009_v50 = vpop.f32.mrb[4].mxu1  ;;  %v1988_v51 = vpop.f32.mrb[5].mxu0 }
 0x186   :  { %v1989_v52 = vadd.f32 %v1988_v51, %v1987_v49  ;;  %v2010_v53 = vpop.f32.mrb[5].mxu1  ;;  %v1990_v54 = vpop.f32.mrb[6].mxu0 }
 0x187   :  { %v2011_v55 = vadd.f32 %v2010_v53, %v2009_v50  ;;  %v2012_v56 = vpop.f32.mrb[6].mxu1  ;;  %v1991_v57 = vpop.f32.mrb[7].mxu0  ;;  %v126_v53 = vld [vmem:[#allocation5] sm:$0xff] }
 0x188   :  { %v769_v58 = vadd.f32 %v1989_v52, %v729_v48  ;;  %v2013_v59 = vpop.f32.mrb[7].mxu1  ;;  %v1093_v56 = vld [vmem:[#allocation11 + $0x48] sm:$0xff] }
 0x189   :  { %v1097_v57 = vld [vmem:[#allocation11 + $0x68] sm:$0xff] }
 0x18a   :  { %v809_v60 = vadd.f32 %v2011_v55, %v769_v58  ;;  %v1865_v63 = vcombine.low %v1093_v56, %v1097_v57 }
 0x18c   :  { %v814_v61 = vmax.f32 %v809_v60, 0.0  ;;  %v1866_v60 = vcombine.high %v1093_v56, %v1097_v57 }
 0x18e   :  { %v815_v62 = vpack.c.bf16 %v814_v61, %v814_v61  ;;  %v1101_v61 = vld [vmem:[#allocation11 + $0x88] sm:$0xff] }
 0x190   :  { %957 = vmatmul.mubr.bf16.vlgmr.msra.gmra.mrb[8].mxu0 %v815_v62  ;;  %v1105_v62 = vld [vmem:[#allocation11 + $0xa8] sm:$0xff] }
 0x191   :  { %1542 = vmatprep.mubr.bf16.mxu0 %v2391_v32  ;;  %1511 = vmatpush1.bf16.msra.mxu0 %v1855_v8  ;;  %v1874_v0 = vcombine.high %v1101_v61, %v1105_v62  ;;  %v1873_v3 = vcombine.low %v1101_v61, %v1105_v62  ;;  %v1881_v8 = vcombine.low %v1109_v1, %v1113_v2  ;;  %v1114_v61 = vld [vmem:[#allocation11 + $0xf0] sm:$0xff]  ;;  %v1111_v62 = vld [vmem:[#allocation11 + $0xd8] sm:$0xff] }
 0x192   :  { %1512 = vmatprep.subr.bf16.mxu0 %v1864_v15  ;;  %v1897_v15 = vcombine.low %v1125_v11, %v1129_v7 }
 0x195   :  { %1513 = vmatpush1.bf16.msra.mxu0 %v1863_v16 }
 0x196   :  { %1514 = vmatprep.subr.bf16.mxu0 %v1872_v19  ;;  %v1144_v19 = vld [vmem:[#allocation11 + $0x1e0] sm:$0xff] }
 0x197   :  { %v1912_v21 = vcombine.high %v1140_v18, %v1144_v19 }
 0x199   :  { %1515 = vmatpush1.bf16.msra.mxu0 %v1871_v20  ;;  %v1141_v20 = vld [vmem:[#allocation11 + $0x1c8] sm:$0xff] }
 0x19a   :  { %1516 = vmatprep.subr.bf16.mxu0 %v1880_v23  ;;  %v1911_v23 = vcombine.low %v1140_v18, %v1144_v19  ;;  %v1914_v25 = vcombine.high %v1141_v20, %v1145_v22  ;;  %v1134_v19 = vld [vmem:[#allocation11 + $0x190] sm:$0xff] }
 0x19d   :  { %1517 = vmatpush1.bf16.msra.mxu0 %v1879_v24  ;;  %v1913_v24 = vcombine.low %v1141_v20, %v1145_v22  ;;  %v1138_v20 = vld [vmem:[#allocation11 + $0x1b0] sm:$0xff]  ;;  %v1139_v22 = vld [vmem:[#allocation11 + $0x1b8] sm:$0xff] }
 0x19e   :  { %1518 = vmatprep.subr.bf16.mxu0 %v1888_v27  ;;  %v1090_v27 = vld [vmem:[#allocation11 + $0x30] sm:$0xff] }
 0x19f   :  { %v1859_v29 = vcombine.low %v1086_v26, %v1090_v27  ;;  %v1860_v30 = vcombine.high %v1086_v26, %v1090_v27  ;;  %v1142_v27 = vld [vmem:[#allocation11 + $0x1d0] sm:$0xff] }
 0x1a1   :  { %1519 = vmatpush1.bf16.msra.mxu0 %v1887_v28  ;;  %v1087_v28 = vld [vmem:[#allocation11 + $0x18] sm:$0xff] }
 0x1a2   :  { %1520 = vmatprep.subr.bf16.mxu0 %v1896_v31  ;;  %v1091_v31 = vld [vmem:[#allocation11 + $0x38] sm:$0xff] }
 0x1a3   :  { %v1862_v34 = vcombine.high %v1087_v28, %v1091_v31 }
 0x1a5   :  { %1521 = vmatpush1.bf16.msra.mxu0 %v1895_v33  ;;  %v1861_v33 = vcombine.low %v1087_v28, %v1091_v31  ;;  %v1146_v28 = vld [vmem:[#allocation11 + $0x1f0] sm:$0xff]  ;;  %v1907_v31 = vcombine.low %v1134_v19, %v1138_v20 }
 0x1a6   :  { %1522 = vmatprep.subr.bf16.mxu0 %v1904_v36 }
 0x1a9   :  { %1523 = vmatpush1.bf16.msra.mxu0 %v1903_v37 }
 0x1aa   :  { %1524 = vmatprep.subr.bf16.mxu0 %v1912_v21  ;;  %v1135_v21 = vld [vmem:[#allocation11 + $0x198] sm:$0xff] }
 0x1ab   :  { %v1910_v26 = vcombine.high %v1135_v21, %v1139_v22 }
 0x1ad   :  { %1525 = vmatpush1.bf16.msra.mxu0 %v1911_v23 }
 0x1ae   :  { %1592 = vmatprep.subr.bf16.mxu0 %v1860_v30  ;;  %v1147_v30 = vld [vmem:[#allocation11 + $0x1f8] sm:$0xff] }
 0x263   :  { %v958_v45 = vpop.f32.mrb[8].mxu0 }
 0x264   :  { %v959_v46 = vadd.f32 %v958_v45, %v837_v43  ;;  %v960_v47 = vpop.f32.mrb[9].mxu0  ;;  %v1095_v45 = vld [vmem:[#allocation11 + $0x58] sm:$0xff] }
 0x265   :  { %v961_v48 = vadd.f32 %v960_v47, %v841_v44  ;;  %v962_v49 = vpop.f32.mrb[10].mxu0  ;;  %v1098_v44 = vld [vmem:[#allocation11 + $0x70] sm:$0xff] }
 0x266   :  { %1731 = vst [vmem:[#allocation14 + $0x8] sm:$0xff] %v959_v46  ;;  %v963_v50 = vpop.f32.mrb[11].mxu0  ;;  %v1867_v56 = vcombine.low %v1094_v41, %v1098_v44 }
 0x267   :  { %v965_v51 = vmul.f32 0.5, %v961_v48  ;;  %1732 = vst [vmem:[#allocation14 + $0x10] sm:$0xff] %v961_v48  ;;  %v1868_v50 = vcombine.high %v1094_v41, %v1098_v44 }
 0x269   :  { %v966_v52 = vmul.f32 1.442695, %v965_v51 }
 0x26b   :  { %2157 = vpow2.f32 %v966_v52  ;;  %v1102_v52 = vld [vmem:[#allocation11 + $0x90] sm:$0xff] }
 0x275   :  { %v2158_v54 = vpop.eup %2157 }
 0x276   :  { %v968_v55 = vmul.f32 %v2158_v54, %v126_v53  ;;  %v1106_v53 = vld [vmem:[#allocation11 + $0xb0] sm:$0xff]  ;;  %v1103_v54 = vld [vmem:[#allocation11 + $0x98] sm:$0xff] }
 0x278   :  { %v969_v58 = vadd.f32 %v968_v55, %v959_v46  ;;  %v1099_v46 = vld [vmem:[#allocation11 + $0x78] sm:$0xff] }
 0x279   :  { %v1870_v51 = vcombine.high %v1095_v45, %v1099_v46  ;;  %v1107_v55 = vld [vmem:[#allocation11 + $0xb8] sm:$0xff]  ;;  %v1869_v57 = vcombine.low %v1095_v45, %v1099_v46 }
 0x27a   :  { %v970_v59 = vpack.c.bf16 %v969_v58, %v969_v58  ;;  %1730 = vst [vmem:[#allocation14] sm:$0xff] %v969_v58  ;;  %v1876_v58 = vcombine.high %v1102_v52, %v1106_v53  ;;  %v1877_v1 = vcombine.low %v1103_v54, %v1107_v55 }
 0x27c   :  { %2041 = vmatmul.mubr.bf16.vlgmr.msra.gmra.mrb[8].mxu1 %v970_v59  ;;  %v1878_v59 = vcombine.high %v1103_v54, %v1107_v55 }
 0x27d   :  { %1552 = vmatpush1.bf16.msra.mxu1 %v1857_v13  ;;  %1583 = vmatprep.mubr.bf16.mxu1 %v2391_v32  ;;  %v1133_v13 = vld [vmem:[#allocation11 + $0x188] sm:$0xff] }
 0x27e   :  { %1553 = vmatprep.subr.bf16.mxu1 %v1866_v60  ;;  %v1906_v16 = vcombine.high %v1133_v13, %v1137_v14  ;;  %v1905_v17 = vcombine.low %v1133_v13, %v1137_v14  ;;  %v1110_v60 = vld [vmem:[#allocation11 + $0xd0] sm:$0xff]  ;;  %v1127_v13 = vld [vmem:[#allocation11 + $0x158] sm:$0xff] }
 0x27f   :  { %v1884_v2 = vcombine.high %v1110_v60, %v1114_v61  ;;  %v1131_v14 = vld [vmem:[#allocation11 + $0x178] sm:$0xff] }
 0x280   :  { %v1902_v18 = vcombine.high %v1127_v13, %v1131_v14 }
 0x281   :  { %1554 = vmatpush1.bf16.msra.mxu1 %v1865_v63  ;;  %v1115_v63 = vld [vmem:[#allocation11 + $0xf8] sm:$0xff] }
 0x282   :  { %1555 = vmatprep.subr.bf16.mxu1 %v1874_v0  ;;  %v1875_v0 = vcombine.low %v1102_v52, %v1106_v53  ;;  %v1885_v11 = vcombine.low %v1111_v62, %v1115_v63 }
 0x285   :  { %1556 = vmatpush1.bf16.msra.mxu1 %v1873_v3  ;;  %v1886_v3 = vcombine.high %v1111_v62, %v1115_v63 }
 0x286   :  { %1557 = vmatprep.subr.bf16.mxu1 %v1882_v4  ;;  %v1118_v4 = vld [vmem:[#allocation11 + $0x110] sm:$0xff] }
 0x287   :  { %v1892_v7 = vcombine.high %v1118_v4, %v1122_v5 }
 0x289   :  { %1558 = vmatpush1.bf16.msra.mxu1 %v1881_v8  ;;  %v1123_v8 = vld [vmem:[#allocation11 + $0x138] sm:$0xff] }
 0x28a   :  { %1559 = vmatprep.subr.bf16.mxu1 %v1890_v9  ;;  %v1883_v9 = vcombine.low %v1110_v60, %v1114_v61 }
 0x28d   :  { %1560 = vmatpush1.bf16.msra.mxu1 %v1889_v10  ;;  %v1126_v10 = vld [vmem:[#allocation11 + $0x150] sm:$0xff] }
 0x28e   :  { %1561 = vmatprep.subr.bf16.mxu1 %v1898_v12  ;;  %v1130_v12 = vld [vmem:[#allocation11 + $0x170] sm:$0xff] }
 0x28f   :  { %v1899_v23 = vcombine.low %v1126_v10, %v1130_v12 }
 0x291   :  { %1562 = vmatpush1.bf16.msra.mxu1 %v1897_v15  ;;  %v1891_v15 = vcombine.low %v1118_v4, %v1122_v5 }
 0x292   :  { %1563 = vmatprep.subr.bf16.mxu1 %v1906_v16  ;;  %v1893_v16 = vcombine.low %v1119_v6, %v1123_v8 }
 0x295   :  { %1564 = vmatpush1.bf16.msra.mxu1 %v1905_v17  ;;  %v1900_v17 = vcombine.high %v1126_v10, %v1130_v12 }
 0x296   :  { %1565 = vmatprep.subr.bf16.mxu1 %v1914_v25  ;;  %v1908_v25 = vcombine.high %v1134_v19, %v1138_v20 }
 0x299   :  { %1566 = vmatpush1.bf16.msra.mxu1 %v1913_v24  ;;  %v1901_v24 = vcombine.low %v1127_v13, %v1131_v14 }
 0x29a   :  { %1633 = vmatprep.subr.bf16.mxu1 %v1862_v34  ;;  %v1916_v34 = vcombine.high %v1142_v27, %v1146_v28 }
 0x34f   :  { %v1076_v36 = vpop.f32.mrb[8].mxu1 }
 0x350   :  { %v1077_v37 = vadd.f32 %v1846_v35, %v1076_v36  ;;  %v2042_v38 = vpop.f32.mrb[9].mxu1  ;;  %v1915_v36 = vcombine.low %v1142_v27, %v1146_v28 }
 0x351   :  { %v1079_v43 = vpop.f32.mrb[10].mxu1 }
 0x352   :  { %v1082_v47 = vmax.f32 %v1077_v37, 0.0  ;;  %v2043_v48 = vpop.f32.mrb[11].mxu1 }
 0x354   :  { %v2580_v49 = vpack.c.bf16 %v1082_v47, %v1082_v47 }
 0x356   :  { %1543 = vmatmul.mubr.bf16.vlgmr.msra.gmra.mrb[12].mxu0 %v2580_v49  ;;  %1584 = vmatmul.mubr.bf16.vlgmr.msra.gmra.mrb[12].mxu1 %v2580_v49 }
 0x357   :  { %1593 = vmatpush1.bf16.msra.mxu0 %v1859_v29  ;;  %1634 = vmatpush1.bf16.msra.mxu1 %v1861_v33  ;;  %v1143_v29 = vld [vmem:[#allocation11 + $0x1d8] sm:$0xff]  ;;  %v1909_v33 = vcombine.low %v1135_v21, %v1139_v22 }
 0x358   :  { %1594 = vmatprep.subr.bf16.mxu0 %v1868_v50  ;;  %1635 = vmatprep.subr.bf16.mxu1 %v1870_v51  ;;  %v1918_v35 = vcombine.high %v1143_v29, %v1147_v30  ;;  %v1917_v37 = vcombine.low %v1143_v29, %v1147_v30 }
 0x359   :  { %1624 = vmatprep.mubr.bf16.mxu0 %v2391_v32  ;;  %1665 = vmatprep.mubr.bf16.mxu1 %v2391_v32  ;;  %v1894_v32 = vcombine.high %v1119_v6, %v1123_v8 }
 0x35b   :  { %1595 = vmatpush1.bf16.msra.mxu0 %v1867_v56  ;;  %1636 = vmatpush1.bf16.msra.mxu1 %v1869_v57 }
 0x35c   :  { %1596 = vmatprep.subr.bf16.mxu0 %v1876_v58  ;;  %1637 = vmatprep.subr.bf16.mxu1 %v1878_v59 }
 0x35f   :  { %1597 = vmatpush1.bf16.msra.mxu0 %v1875_v0  ;;  %1638 = vmatpush1.bf16.msra.mxu1 %v1877_v1 }
 0x360   :  { %1598 = vmatprep.subr.bf16.mxu0 %v1884_v2  ;;  %1639 = vmatprep.subr.bf16.mxu1 %v1886_v3 }
 0x363   :  { %1599 = vmatpush1.bf16.msra.mxu0 %v1883_v9  ;;  %1640 = vmatpush1.bf16.msra.mxu1 %v1885_v11 }
 0x364   :  { %1600 = vmatprep.subr.bf16.mxu0 %v1892_v7  ;;  %1641 = vmatprep.subr.bf16.mxu1 %v1894_v32 }
 0x367   :  { %1601 = vmatpush1.bf16.msra.mxu0 %v1891_v15  ;;  %1642 = vmatpush1.bf16.msra.mxu1 %v1893_v16 }
 0x368   :  { %1602 = vmatprep.subr.bf16.mxu0 %v1900_v17  ;;  %1643 = vmatprep.subr.bf16.mxu1 %v1902_v18 }
 0x36b   :  { %1603 = vmatpush1.bf16.msra.mxu0 %v1899_v23  ;;  %1644 = vmatpush1.bf16.msra.mxu1 %v1901_v24 }
 0x36c   :  { %1604 = vmatprep.subr.bf16.mxu0 %v1908_v25  ;;  %1645 = vmatprep.subr.bf16.mxu1 %v1910_v26 }
 0x36f   :  { %1605 = vmatpush1.bf16.msra.mxu0 %v1907_v31  ;;  %1646 = vmatpush1.bf16.msra.mxu1 %v1909_v33 }
 0x370   :  { %1606 = vmatprep.subr.bf16.mxu0 %v1916_v34  ;;  %1647 = vmatprep.subr.bf16.mxu1 %v1918_v35 }
 0x373   :  { %1607 = vmatpush1.bf16.msra.mxu0 %v1915_v36  ;;  %1648 = vmatpush1.bf16.msra.mxu1 %v1917_v37 }
 0x376   :  { %1625 = vmatmul.mubr.bf16.vlgmr.msra.gmra.mrb[16].mxu0 %v2580_v49  ;;  %1666 = vmatmul.mubr.bf16.vlgmr.msra.gmra.mrb[16].mxu1 %v2580_v49 }
 0x377   :  { %2334 = shalt.err (!%p2331_p10)
}
 0x378   :  { %s2335_s17 = scalar_lea.hbm %s2636_s11, 384 }
 0x379   :  { %p2336_p11 = scmp.ne.s32.totalorder %s2636_s11, %s2335_s17  ;;  %p2339_p12 = scmp.lt.u32.totalorder %s2335_s17, %s2636_s11 }
 0x37b   :  { %p2341_p13 = pnand %p2339_p12, %p2336_p11 }
 0x37d   :  { %2344 = shalt.err (!%p2341_p13)
}
 0x37e   :  { %1752 = dma.vmem_to_hbm [thread:$0]  %s1750_s15, 384, %s2636_s11, [#allocation15]   ;;  %v1160_v38 = vsub.s32 2, %v2562_v39  ;;  %v1148_v41 = vld [vmem:[%s2634_s9] sm:$0xff]  ;;  %v1164_v43 = vsub.s32 3, %v2562_v39  ;;  %v1168_v6 = vsub.s32 4, %v2562_v39 }
 0x37f   :  { %v1153_v44 = vrot.slane %v1148_v41, %v836_v40  ;;  %v1157_v46 = vrot.slane %v1148_v41, %v840_v42  ;;  %v1176_v8 = vsub.s32 6, %v2562_v39  ;;  %v1172_v9 = vsub.s32 5, %v2562_v39  ;;  %s2395_s9 = smov [#allocation13]  }
 0x380   :  { %v1161_v45 = vrot.slane %v1148_v41, %v1160_v38  ;;  %v1165_v47 = vrot.slane %v1148_v41, %v1164_v43  ;;  %v1180_v11 = vsub.s32 7, %v2562_v39  ;;  %v1169_v10 = vrot.slane %v1148_v41, %v1168_v6  ;;  %s1739_s11 = sshll.u32 %s2395_s9, 4  ;;  %s1740_s11 = int_to_ptr.vmem [resolvable:$true] %s1739_s11 }
 0x381   :  { %v1177_v12 = vrot.slane %v1148_v41, %v1176_v8  ;;  %v1173_v14 = vrot.slane %v1148_v41, %v1172_v9  ;;  %s2345_s24 = scalar_lea.vmem %s1740_s11, 1024  ;;  %p2350_p1 = scmp.lt.s32.totalorder %s1740_s11, %s1740_s11 }
 0x382   :  { %v1181_v15 = vrot.slane %v1148_v41, %v1180_v11  ;;  %p2346_p0 = scmp.ne.s32.totalorder %s1740_s11, %s2345_s24  ;;  %p2351_p2 = scmp.lt.s32.totalorder %s2345_s24, %s2345_s24 }
 0x384   :  { %p2352_p3 = por %p2351_p2, %p2350_p1 }
 0x386   :  { %p2353_p4 = pnand %p2352_p3, %p2346_p0 }
 0x429   :  { %v1544_v48 = vpop.f32.mrb[12].mxu0  ;;  %v1585_v49 = vpop.f32.mrb[12].mxu1 }
 0x42a   :  { %v1545_v50 = vadd.f32 %v1544_v48, %v1153_v44  ;;  %v1586_v51 = vadd.f32 %v1585_v49, %v1161_v45  ;;  %v1546_v52 = vpop.f32.mrb[13].mxu0  ;;  %v1587_v53 = vpop.f32.mrb[13].mxu1 }
 0x42b   :  { %v1547_v54 = vadd.f32 %v1546_v52, %v1157_v46  ;;  %v1588_v55 = vadd.f32 %v1587_v53, %v1165_v47  ;;  %v1548_v56 = vpop.f32.mrb[14].mxu0  ;;  %v1589_v57 = vpop.f32.mrb[14].mxu1 }
 0x42c   :  { %v1919_v58 = vmul.f32 -1.442695, %v1545_v50  ;;  %v1921_v59 = vmul.f32 -1.442695, %v1586_v51  ;;  %v1549_v60 = vpop.f32.mrb[15].mxu0  ;;  %v1590_v61 = vpop.f32.mrb[15].mxu1 }
 0x42d   :  { %v1920_v40 = vmul.f32 -1.442695, %v1547_v54  ;;  %v1922_v62 = vmul.f32 -1.442695, %v1588_v55 }
 0x42e   :  { %2159 = vpow2.f32 %v1919_v58 }
 0x42f   :  { %2161 = vpow2.f32 %v1921_v59 }
 0x430   :  { %2163 = vpow2.f32 %v1920_v40 }
 0x431   :  { %2165 = vpow2.f32 %v1922_v62 }
 0x438   :  { %v2160_v42 = vpop.eup %2159 }
 0x439   :  { %v2162_v63 = vpop.eup %2161  ;;  %v1698_v0 = vadd.f32 1.0, %v2160_v42 }
 0x43a   :  { %v2164_v1 = vpop.eup %2163  ;;  %v1700_v2 = vadd.f32 1.0, %v2162_v63 }
 0x43b   :  { %v2166_v3 = vpop.eup %2165  ;;  %2167 = vrcp.f32 %v1698_v0  ;;  %v1699_v4 = vadd.f32 1.0, %v2164_v1 }
 0x43c   :  { %2169 = vrcp.f32 %v1700_v2  ;;  %v1701_v5 = vadd.f32 1.0, %v2166_v3 }
 0x43d   :  { %2171 = vrcp.f32 %v1699_v4 }
 0x43e   :  { %2173 = vrcp.f32 %v1701_v5 }
 0x445   :  { %v2168_v7 = vpop.eup %2167 }
 0x446   :  { %v2170_v32 = vpop.eup %2169  ;;  %1722 = vst [vmem:[#allocation13] sm:$0xff] %v2168_v7 }
 0x447   :  { %v2172_v13 = vpop.eup %2171  ;;  %1724 = vst [vmem:[#allocation13 + $0x10] sm:$0xff] %v2170_v32 }
 0x448   :  { %v2174_v16 = vpop.eup %2173  ;;  %1723 = vst [vmem:[#allocation13 + $0x8] sm:$0xff] %v2172_v13 }
 0x449   :  { %1725 = vst [vmem:[#allocation13 + $0x18] sm:$0xff] %v2174_v16  ;;  %v1626_v17 = vpop.f32.mrb[16].mxu0  ;;  %v1667_v18 = vpop.f32.mrb[16].mxu1 }
 0x44a   :  { %v1627_v19 = vadd.f32 %v1626_v17, %v1169_v10  ;;  %v1668_v20 = vadd.f32 %v1667_v18, %v1177_v12  ;;  %v1628_v21 = vpop.f32.mrb[17].mxu0  ;;  %v1669_v22 = vpop.f32.mrb[17].mxu1 }
 0x44b   :  { %v1629_v23 = vadd.f32 %v1628_v21, %v1173_v14  ;;  %v1670_v39 = vadd.f32 %v1669_v22, %v1181_v15  ;;  %v1630_v24 = vpop.f32.mrb[18].mxu0  ;;  %v1671_v25 = vpop.f32.mrb[18].mxu1 }
 0x44c   :  { %v1923_v26 = vmul.f32 -1.442695, %v1627_v19  ;;  %v1925_v27 = vmul.f32 -1.442695, %v1668_v20  ;;  %v1631_v28 = vpop.f32.mrb[19].mxu0  ;;  %v1672_v29 = vpop.f32.mrb[19].mxu1 }
 0x44d   :  { %v1924_v30 = vmul.f32 -1.442695, %v1629_v23  ;;  %v1926_v31 = vmul.f32 -1.442695, %v1670_v39 }
 0x44e   :  { %2175 = vpow2.f32 %v1923_v26 }
 0x44f   :  { %2177 = vpow2.f32 %v1925_v27 }
 0x450   :  { %2179 = vpow2.f32 %v1924_v30 }
 0x451   :  { %2181 = vpow2.f32 %v1926_v31 }
 0x458   :  { %v2176_v33 = vpop.eup %2175 }
 0x459   :  { %v2178_v34 = vpop.eup %2177  ;;  %v1702_v35 = vadd.f32 1.0, %v2176_v33 }
 0x45a   :  { %v2180_v36 = vpop.eup %2179  ;;  %v1704_v37 = vadd.f32 1.0, %v2178_v34 }
 0x45b   :  { %v2182_v38 = vpop.eup %2181  ;;  %2183 = vrcp.f32 %v1702_v35  ;;  %v1703_v41 = vadd.f32 1.0, %v2180_v36 }
 0x45c   :  { %2185 = vrcp.f32 %v1704_v37  ;;  %v1705_v43 = vadd.f32 1.0, %v2182_v38 }
 0x45d   :  { %2187 = vrcp.f32 %v1703_v41 }
 0x45e   :  { %2189 = vrcp.f32 %v1705_v43 }
 0x465   :  { %v2184_v44 = vpop.eup %2183 }
 0x466   :  { %v2186_v45 = vpop.eup %2185  ;;  %1726 = vst [vmem:[#allocation13 + $0x20] sm:$0xff] %v2184_v44 }
 0x467   :  { %v2188_v46 = vpop.eup %2187  ;;  %1728 = vst [vmem:[#allocation13 + $0x30] sm:$0xff] %v2186_v45 }
 0x468   :  { %v2190_v47 = vpop.eup %2189  ;;  %1727 = vst [vmem:[#allocation13 + $0x28] sm:$0xff] %v2188_v46 }
 0x469   :  { %1729 = vst [vmem:[#allocation13 + $0x38] sm:$0xff] %v2190_v47 }
 0x46a   :  { %2356 = shalt.err (!%p2353_p4)
}
 0x46b   :  { %s2357_s29 = scalar_lea.hbm %s2635_s10, 1024 }
 0x46c   :  { %p2358_p5 = scmp.ne.s32.totalorder %s2635_s10, %s2357_s29  ;;  %p2361_p6 = scmp.lt.u32.totalorder %s2357_s29, %s2635_s10 }
 0x46e   :  { %p2363_p7 = pnand %p2361_p6, %p2358_p5 }
 0x470   :  { %2366 = shalt.err (!%p2363_p7)
}
 0x471   :  { %1742 = dma.vmem_to_hbm [thread:$0]  %s1740_s11, 1024, %s2635_s10, [#allocation4]  }
 0x472   :  { %2375 = dma.done.wait [#allocation4], 1024  }
 0x473   :  { %2376 = vsyncadd [#allocation4], 4294966272 }
 0x474   :  { %2377 = dma.done.wait [#allocation15], 384  }
 0x475   :  { %2378 = vsyncadd [#allocation15], 4294966912 }
 0x476   :  { %1759 = vsyncpa [#allocation3], 1 }
 0x477   :  { %1760 = vsyncpa [#allocation6], 1 }
 0x478   :  { %1761 = vsyncpa [#allocation9], 1 }
 0x479   :  { %1762 = vsyncpa [#allocation12], 1 }
 0x47a   :  { %1763 = vsyncpa [#allocation4], 1 }
 0x47b   :  { %1764 = vsyncpa [#allocation15], 1 }

</bundles_post_ra>
